<compile_context>
chip_gen: v7x
topology: tpu7x:2x2x1
jax: 0.10.0
libtpu: 0.0.40
codegen_flags: <defaults>
</compile_context>

<pallas_src>
import jax
import jax.numpy as jnp
from jax.experimental import pallas as pl
from jax.experimental.pallas import tpu as pltpu

# Shapes implied by the module
B, S, H = 1, 384, 256
N_HEADS, HEAD_DIM = 4, 64
VIEW_SHAPE = (B, S, N_HEADS, HEAD_DIM)


def identity_kernel(x_ref, o_ref):
    # Lane-dense (S, H) identity copy: no in-kernel reshape, so Mosaic emits
    # plain full-width loads/stores with zero relayout work.
    o_ref[...] = x_ref[...]


def m_forward(x450, x465=VIEW_SHAPE):
    assert x450.shape == (B, S, H)
    assert tuple(x465) == VIEW_SHAPE

    # NOTE: the ideal implementation is simply `jnp.reshape(x450, x465)`
    # (metadata-only bitcast).  The minimal kernel below exists only as a
    # fusion anchor per the task requirements and adds no relayout work.
    x2d = x450.reshape(S, H)  # metadata-only

    out2d = pl.pallas_call(
        identity_kernel,
        out_shape=jax.ShapeDtypeStruct((S, H), x450.dtype),
        in_specs=[pl.BlockSpec((S, H), lambda: (0, 0),
                               memory_space=pltpu.VMEM)],
        out_specs=pl.BlockSpec((S, H), lambda: (0, 0),
                               memory_space=pltpu.VMEM),
        input_output_aliases={0: 0},
    )(x2d)

    # The H -> (N_HEADS, HEAD_DIM) split and the leading batch dim are
    # restored as free wrapper reshapes (metadata-only in XLA).
    return out2d.reshape(x465)


if __name__ == "__main__":
    key = jax.random.PRNGKey(0)
    x450 = jax.random.normal(key, (B, S, H), dtype=jnp.float32)

    x466 = m_forward(x450, VIEW_SHAPE)
    jax.block_until_ready(x466)

    # Correctness check against the pure-JAX reference of torch's .view()
    ref = jnp.reshape(x450, VIEW_SHAPE)
    assert x466.shape == VIEW_SHAPE
    assert x466.dtype == x450.dtype
    assert bool(jnp.array_equal(x466, ref))

    print("KERNEL_OK")
</pallas_src>

<mosaic_0001>
module attributes {stable_mosaic.version = 11 : i64} {
  func.func @identity_kernel(%arg0: memref<384x256xf32, #tpu.memory_space<vmem>>, %arg1: memref<384x256xf32, #tpu.memory_space<vmem>>) attributes {dimension_semantics = [], scalar_prefetch = 0 : i64, scratch_operands = 0 : i64, tpu.core_type = #tpu.core_type<tc>} {
    %c0 = arith.constant 0 : index
    %c0_0 = arith.constant 0 : index
    %0 = vector.load %arg0[%c0, %c0_0] : memref<384x256xf32, #tpu.memory_space<vmem>>, vector<384x256xf32>
    %c0_1 = arith.constant 0 : index
    %c0_2 = arith.constant 0 : index
    %1 = vector.load %arg1[%c0_1, %c0_2] : memref<384x256xf32, #tpu.memory_space<vmem>>, vector<384x256xf32>
    tpu.vector_store %arg1[%c0_1, %c0_2], %0 {strides = array<i32>} : memref<384x256xf32, #tpu.memory_space<vmem>>, vector<384x256xf32>,
    return
  }
}

</mosaic_0001>

<bundles_post_ra>
// kernel: tpu_custom_call.1
= control target key start
LH: loop header
LB: loop body
LE: loop exit
PB: predicated region body
PF: predicated region fallthrough
CT: control target
= control target key end

     0   :  { %6 = vsyncpa [#allocation3], 0  ;;  %s328_s0 = inlined_call_operand.hbm [shape: f32[384,256], index: 0, kind: input, shape index: {}, may-alias: {0,1}]   ;;  %s329_s1 = inlined_call_operand.hbm [shape: f32[384,256], index: 1, kind: output, shape index: {}, may-alias: {0,1}]  }
   0x1   :  { %7 = vsyncpa [#allocation4], 0  ;;  %s284_s6 = smov [#allocation2]   ;;  %s236_s10 = scalar_lea.hbm %s328_s0, 12288 }
   0x2   :  { %s13_s7 = sshll.u32 %s284_s6, 4  ;;  %p237_p0 = scmp.ne.s32.totalorder %s328_s0, %s236_s10  ;;  %s14_s7 = int_to_ptr.vmem [resolvable:$true] %s13_s7 }
   0x3   :  { %p240_p1 = scmp.lt.u32.totalorder %s236_s10, %s328_s0 }
   0x5   :  { %p242_p2 = pnand %p240_p1, %p237_p0 }
   0x7   :  { %245 = shalt.err (!%p242_p2)
}
   0x8   :  { %s246_s15 = scalar_lea.vmem %s14_s7, 12288  ;;  %p251_p4 = scmp.lt.s32.totalorder %s14_s7, %s14_s7 }
   0x9   :  { %p247_p3 = scmp.ne.s32.totalorder %s14_s7, %s246_s15  ;;  %p252_p5 = scmp.lt.s32.totalorder %s246_s15, %s246_s15 }
   0xb   :  { %p253_p6 = por %p252_p5, %p251_p4 }
   0xd   :  { %p254_p7 = pnand %p253_p6, %p247_p3 }
   0xf   :  { %257 = shalt.err (!%p254_p7)
}
  0x10   :  { %s285_s16 = smov 256   ;;  %s286_s17 = smov 16  }
  0x11   :  { %19 = dma.hbm_to_vmem [thread:$0]  %s328_s0, 12288, %s14_s7, [#allocation3], %s285_s16, %s285_s16, %s286_s17  }
  0x12   :  { %280 = dma.done.wait [#allocation3], 12288  }
  0x13   :  { %281 = vsyncadd [#allocation3], 4294955008  ;;  %v23_v0 = vld [vmem:[#allocation2] sm:$0xff]  ;;  %v24_v1 = vld [vmem:[#allocation2 + $0x8] sm:$0xff]  ;;  %s287_s0 = smov [#allocation5]  }
  0x14   :  { %v25_v2 = vld [vmem:[#allocation2 + $0x10] sm:$0xff]  ;;  %119 = vst [vmem:[#allocation5] sm:$0xff] %v23_v0  ;;  %120 = vst [vmem:[#allocation5 + $0x8] sm:$0xff] %v24_v1  ;;  %v26_v3 = vld [vmem:[#allocation2 + $0x18] sm:$0xff]  ;;  %s220_s20 = sshll.u32 %s287_s0, 4  ;;  %s221_s20 = int_to_ptr.vmem [resolvable:$true] %s220_s20 }
  0x15   :  { %121 = vst [vmem:[#allocation5 + $0x10] sm:$0xff] %v25_v2  ;;  %v27_v4 = vld [vmem:[#allocation2 + $0x20] sm:$0xff]  ;;  %v28_v5 = vld [vmem:[#allocation2 + $0x28] sm:$0xff]  ;;  %122 = vst [vmem:[#allocation5 + $0x18] sm:$0xff] %v26_v3  ;;  %s258_s21 = scalar_lea.vmem %s221_s20, 12288  ;;  %p263_p9 = scmp.lt.s32.totalorder %s221_s20, %s221_s20 }
  0x16   :  { %123 = vst [vmem:[#allocation5 + $0x20] sm:$0xff] %v27_v4  ;;  %124 = vst [vmem:[#allocation5 + $0x28] sm:$0xff] %v28_v5  ;;  %v29_v6 = vld [vmem:[#allocation2 + $0x30] sm:$0xff]  ;;  %v30_v7 = vld [vmem:[#allocation2 + $0x38] sm:$0xff]  ;;  %p259_p8 = scmp.ne.s32.totalorder %s221_s20, %s258_s21  ;;  %p264_p10 = scmp.lt.s32.totalorder %s258_s21, %s258_s21 }
  0x17   :  { %v31_v8 = vld [vmem:[#allocation2 + $0x40] sm:$0xff]  ;;  %125 = vst [vmem:[#allocation5 + $0x30] sm:$0xff] %v29_v6  ;;  %126 = vst [vmem:[#allocation5 + $0x38] sm:$0xff] %v30_v7  ;;  %v32_v9 = vld [vmem:[#allocation2 + $0x48] sm:$0xff] }
  0x18   :  { %127 = vst [vmem:[#allocation5 + $0x40] sm:$0xff] %v31_v8  ;;  %v33_v10 = vld [vmem:[#allocation2 + $0x50] sm:$0xff]  ;;  %v34_v11 = vld [vmem:[#allocation2 + $0x58] sm:$0xff]  ;;  %128 = vst [vmem:[#allocation5 + $0x48] sm:$0xff] %v32_v9  ;;  %p265_p11 = por %p264_p10, %p263_p9 }
  0x19   :  { %129 = vst [vmem:[#allocation5 + $0x50] sm:$0xff] %v33_v10  ;;  %130 = vst [vmem:[#allocation5 + $0x58] sm:$0xff] %v34_v11  ;;  %v35_v12 = vld [vmem:[#allocation2 + $0x60] sm:$0xff]  ;;  %v36_v13 = vld [vmem:[#allocation2 + $0x68] sm:$0xff] }
  0x1a   :  { %v37_v14 = vld [vmem:[#allocation2 + $0x70] sm:$0xff]  ;;  %131 = vst [vmem:[#allocation5 + $0x60] sm:$0xff] %v35_v12  ;;  %132 = vst [vmem:[#allocation5 + $0x68] sm:$0xff] %v36_v13  ;;  %v38_v15 = vld [vmem:[#allocation2 + $0x78] sm:$0xff]  ;;  %p266_p12 = pnand %p265_p11, %p259_p8 }
  0x1b   :  { %133 = vst [vmem:[#allocation5 + $0x70] sm:$0xff] %v37_v14  ;;  %v39_v16 = vld [vmem:[#allocation2 + $0x80] sm:$0xff]  ;;  %v40_v17 = vld [vmem:[#allocation2 + $0x88] sm:$0xff]  ;;  %134 = vst [vmem:[#allocation5 + $0x78] sm:$0xff] %v38_v15 }
  0x1c   :  { %135 = vst [vmem:[#allocation5 + $0x80] sm:$0xff] %v39_v16  ;;  %136 = vst [vmem:[#allocation5 + $0x88] sm:$0xff] %v40_v17  ;;  %v41_v18 = vld [vmem:[#allocation2 + $0x90] sm:$0xff]  ;;  %v42_v19 = vld [vmem:[#allocation2 + $0x98] sm:$0xff] }
  0x1d   :  { %v43_v20 = vld [vmem:[#allocation2 + $0xa0] sm:$0xff]  ;;  %137 = vst [vmem:[#allocation5 + $0x90] sm:$0xff] %v41_v18  ;;  %138 = vst [vmem:[#allocation5 + $0x98] sm:$0xff] %v42_v19  ;;  %v44_v21 = vld [vmem:[#allocation2 + $0xa8] sm:$0xff] }
  0x1e   :  { %139 = vst [vmem:[#allocation5 + $0xa0] sm:$0xff] %v43_v20  ;;  %v45_v22 = vld [vmem:[#allocation2 + $0xb0] sm:$0xff]  ;;  %v46_v23 = vld [vmem:[#allocation2 + $0xb8] sm:$0xff]  ;;  %140 = vst [vmem:[#allocation5 + $0xa8] sm:$0xff] %v44_v21 }
  0x1f   :  { %141 = vst [vmem:[#allocation5 + $0xb0] sm:$0xff] %v45_v22  ;;  %142 = vst [vmem:[#allocation5 + $0xb8] sm:$0xff] %v46_v23  ;;  %v47_v24 = vld [vmem:[#allocation2 + $0xc0] sm:$0xff]  ;;  %v48_v25 = vld [vmem:[#allocation2 + $0xc8] sm:$0xff] }
  0x20   :  { %v49_v26 = vld [vmem:[#allocation2 + $0xd0] sm:$0xff]  ;;  %143 = vst [vmem:[#allocation5 + $0xc0] sm:$0xff] %v47_v24  ;;  %144 = vst [vmem:[#allocation5 + $0xc8] sm:$0xff] %v48_v25  ;;  %v50_v27 = vld [vmem:[#allocation2 + $0xd8] sm:$0xff] }
  0x21   :  { %145 = vst [vmem:[#allocation5 + $0xd0] sm:$0xff] %v49_v26  ;;  %v51_v28 = vld [vmem:[#allocation2 + $0xe0] sm:$0xff]  ;;  %v52_v29 = vld [vmem:[#allocation2 + $0xe8] sm:$0xff]  ;;  %146 = vst [vmem:[#allocation5 + $0xd8] sm:$0xff] %v50_v27 }
  0x22   :  { %147 = vst [vmem:[#allocation5 + $0xe0] sm:$0xff] %v51_v28  ;;  %148 = vst [vmem:[#allocation5 + $0xe8] sm:$0xff] %v52_v29  ;;  %v53_v30 = vld [vmem:[#allocation2 + $0xf0] sm:$0xff]  ;;  %v54_v31 = vld [vmem:[#allocation2 + $0xf8] sm:$0xff] }
  0x23   :  { %v55_v32 = vld [vmem:[#allocation2 + $0x100] sm:$0xff]  ;;  %149 = vst [vmem:[#allocation5 + $0xf0] sm:$0xff] %v53_v30  ;;  %150 = vst [vmem:[#allocation5 + $0xf8] sm:$0xff] %v54_v31  ;;  %v56_v33 = vld [vmem:[#allocation2 + $0x108] sm:$0xff] }
  0x24   :  { %151 = vst [vmem:[#allocation5 + $0x100] sm:$0xff] %v55_v32  ;;  %v57_v34 = vld [vmem:[#allocation2 + $0x110] sm:$0xff]  ;;  %v58_v35 = vld [vmem:[#allocation2 + $0x118] sm:$0xff]  ;;  %152 = vst [vmem:[#allocation5 + $0x108] sm:$0xff] %v56_v33 }
  0x25   :  { %153 = vst [vmem:[#allocation5 + $0x110] sm:$0xff] %v57_v34  ;;  %154 = vst [vmem:[#allocation5 + $0x118] sm:$0xff] %v58_v35  ;;  %v59_v36 = vld [vmem:[#allocation2 + $0x120] sm:$0xff]  ;;  %v60_v37 = vld [vmem:[#allocation2 + $0x128] sm:$0xff] }
  0x26   :  { %v61_v38 = vld [vmem:[#allocation2 + $0x130] sm:$0xff]  ;;  %155 = vst [vmem:[#allocation5 + $0x120] sm:$0xff] %v59_v36  ;;  %156 = vst [vmem:[#allocation5 + $0x128] sm:$0xff] %v60_v37  ;;  %v62_v39 = vld [vmem:[#allocation2 + $0x138] sm:$0xff] }
  0x27   :  { %157 = vst [vmem:[#allocation5 + $0x130] sm:$0xff] %v61_v38  ;;  %v63_v40 = vld [vmem:[#allocation2 + $0x140] sm:$0xff]  ;;  %v64_v41 = vld [vmem:[#allocation2 + $0x148] sm:$0xff]  ;;  %158 = vst [vmem:[#allocation5 + $0x138] sm:$0xff] %v62_v39 }
  0x28   :  { %159 = vst [vmem:[#allocation5 + $0x140] sm:$0xff] %v63_v40  ;;  %160 = vst [vmem:[#allocation5 + $0x148] sm:$0xff] %v64_v41  ;;  %v65_v42 = vld [vmem:[#allocation2 + $0x150] sm:$0xff]  ;;  %v66_v43 = vld [vmem:[#allocation2 + $0x158] sm:$0xff] }
  0x29   :  { %v67_v44 = vld [vmem:[#allocation2 + $0x160] sm:$0xff]  ;;  %161 = vst [vmem:[#allocation5 + $0x150] sm:$0xff] %v65_v42  ;;  %162 = vst [vmem:[#allocation5 + $0x158] sm:$0xff] %v66_v43  ;;  %v68_v45 = vld [vmem:[#allocation2 + $0x168] sm:$0xff] }
  0x2a   :  { %163 = vst [vmem:[#allocation5 + $0x160] sm:$0xff] %v67_v44  ;;  %v69_v46 = vld [vmem:[#allocation2 + $0x170] sm:$0xff]  ;;  %v70_v47 = vld [vmem:[#allocation2 + $0x178] sm:$0xff]  ;;  %164 = vst [vmem:[#allocation5 + $0x168] sm:$0xff] %v68_v45 }
  0x2b   :  { %165 = vst [vmem:[#allocation5 + $0x170] sm:$0xff] %v69_v46  ;;  %166 = vst [vmem:[#allocation5 + $0x178] sm:$0xff] %v70_v47  ;;  %v71_v48 = vld [vmem:[#allocation2 + $0x180] sm:$0xff]  ;;  %v72_v49 = vld [vmem:[#allocation2 + $0x188] sm:$0xff] }
  0x2c   :  { %v73_v50 = vld [vmem:[#allocation2 + $0x190] sm:$0xff]  ;;  %167 = vst [vmem:[#allocation5 + $0x180] sm:$0xff] %v71_v48  ;;  %168 = vst [vmem:[#allocation5 + $0x188] sm:$0xff] %v72_v49  ;;  %v74_v51 = vld [vmem:[#allocation2 + $0x198] sm:$0xff] }
  0x2d   :  { %169 = vst [vmem:[#allocation5 + $0x190] sm:$0xff] %v73_v50  ;;  %v75_v52 = vld [vmem:[#allocation2 + $0x1a0] sm:$0xff]  ;;  %v76_v53 = vld [vmem:[#allocation2 + $0x1a8] sm:$0xff]  ;;  %170 = vst [vmem:[#allocation5 + $0x198] sm:$0xff] %v74_v51 }
  0x2e   :  { %171 = vst [vmem:[#allocation5 + $0x1a0] sm:$0xff] %v75_v52  ;;  %172 = vst [vmem:[#allocation5 + $0x1a8] sm:$0xff] %v76_v53  ;;  %v77_v54 = vld [vmem:[#allocation2 + $0x1b0] sm:$0xff]  ;;  %v78_v55 = vld [vmem:[#allocation2 + $0x1b8] sm:$0xff] }
  0x2f   :  { %v79_v56 = vld [vmem:[#allocation2 + $0x1c0] sm:$0xff]  ;;  %173 = vst [vmem:[#allocation5 + $0x1b0] sm:$0xff] %v77_v54  ;;  %174 = vst [vmem:[#allocation5 + $0x1b8] sm:$0xff] %v78_v55  ;;  %v80_v57 = vld [vmem:[#allocation2 + $0x1c8] sm:$0xff] }
  0x30   :  { %175 = vst [vmem:[#allocation5 + $0x1c0] sm:$0xff] %v79_v56  ;;  %v81_v58 = vld [vmem:[#allocation2 + $0x1d0] sm:$0xff]  ;;  %v82_v59 = vld [vmem:[#allocation2 + $0x1d8] sm:$0xff]  ;;  %176 = vst [vmem:[#allocation5 + $0x1c8] sm:$0xff] %v80_v57 }
  0x31   :  { %177 = vst [vmem:[#allocation5 + $0x1d0] sm:$0xff] %v81_v58  ;;  %178 = vst [vmem:[#allocation5 + $0x1d8] sm:$0xff] %v82_v59  ;;  %v83_v60 = vld [vmem:[#allocation2 + $0x1e0] sm:$0xff]  ;;  %v84_v61 = vld [vmem:[#allocation2 + $0x1e8] sm:$0xff] }
  0x32   :  { %v85_v62 = vld [vmem:[#allocation2 + $0x1f0] sm:$0xff]  ;;  %179 = vst [vmem:[#allocation5 + $0x1e0] sm:$0xff] %v83_v60  ;;  %180 = vst [vmem:[#allocation5 + $0x1e8] sm:$0xff] %v84_v61  ;;  %v86_v63 = vld [vmem:[#allocation2 + $0x1f8] sm:$0xff] }
  0x33   :  { %181 = vst [vmem:[#allocation5 + $0x1f0] sm:$0xff] %v85_v62  ;;  %v87_v0 = vld [vmem:[#allocation2 + $0x200] sm:$0xff]  ;;  %v88_v1 = vld [vmem:[#allocation2 + $0x208] sm:$0xff]  ;;  %182 = vst [vmem:[#allocation5 + $0x1f8] sm:$0xff] %v86_v63 }
  0x34   :  { %183 = vst [vmem:[#allocation5 + $0x200] sm:$0xff] %v87_v0  ;;  %184 = vst [vmem:[#allocation5 + $0x208] sm:$0xff] %v88_v1  ;;  %v89_v2 = vld [vmem:[#allocation2 + $0x210] sm:$0xff]  ;;  %v90_v3 = vld [vmem:[#allocation2 + $0x218] sm:$0xff] }
  0x35   :  { %v91_v4 = vld [vmem:[#allocation2 + $0x220] sm:$0xff]  ;;  %185 = vst [vmem:[#allocation5 + $0x210] sm:$0xff] %v89_v2  ;;  %186 = vst [vmem:[#allocation5 + $0x218] sm:$0xff] %v90_v3  ;;  %v92_v5 = vld [vmem:[#allocation2 + $0x228] sm:$0xff] }
  0x36   :  { %187 = vst [vmem:[#allocation5 + $0x220] sm:$0xff] %v91_v4  ;;  %v93_v6 = vld [vmem:[#allocation2 + $0x230] sm:$0xff]  ;;  %v94_v7 = vld [vmem:[#allocation2 + $0x238] sm:$0xff]  ;;  %188 = vst [vmem:[#allocation5 + $0x228] sm:$0xff] %v92_v5 }
  0x37   :  { %189 = vst [vmem:[#allocation5 + $0x230] sm:$0xff] %v93_v6  ;;  %190 = vst [vmem:[#allocation5 + $0x238] sm:$0xff] %v94_v7  ;;  %v95_v8 = vld [vmem:[#allocation2 + $0x240] sm:$0xff]  ;;  %v96_v9 = vld [vmem:[#allocation2 + $0x248] sm:$0xff] }
  0x38   :  { %v97_v10 = vld [vmem:[#allocation2 + $0x250] sm:$0xff]  ;;  %191 = vst [vmem:[#allocation5 + $0x240] sm:$0xff] %v95_v8  ;;  %192 = vst [vmem:[#allocation5 + $0x248] sm:$0xff] %v96_v9  ;;  %v98_v11 = vld [vmem:[#allocation2 + $0x258] sm:$0xff] }
  0x39   :  { %193 = vst [vmem:[#allocation5 + $0x250] sm:$0xff] %v97_v10  ;;  %v99_v12 = vld [vmem:[#allocation2 + $0x260] sm:$0xff]  ;;  %v100_v13 = vld [vmem:[#allocation2 + $0x268] sm:$0xff]  ;;  %194 = vst [vmem:[#allocation5 + $0x258] sm:$0xff] %v98_v11 }
  0x3a   :  { %195 = vst [vmem:[#allocation5 + $0x260] sm:$0xff] %v99_v12  ;;  %196 = vst [vmem:[#allocation5 + $0x268] sm:$0xff] %v100_v13  ;;  %v101_v14 = vld [vmem:[#allocation2 + $0x270] sm:$0xff]  ;;  %v102_v15 = vld [vmem:[#allocation2 + $0x278] sm:$0xff] }
  0x3b   :  { %v103_v16 = vld [vmem:[#allocation2 + $0x280] sm:$0xff]  ;;  %197 = vst [vmem:[#allocation5 + $0x270] sm:$0xff] %v101_v14  ;;  %198 = vst [vmem:[#allocation5 + $0x278] sm:$0xff] %v102_v15  ;;  %v104_v17 = vld [vmem:[#allocation2 + $0x288] sm:$0xff] }
  0x3c   :  { %199 = vst [vmem:[#allocation5 + $0x280] sm:$0xff] %v103_v16  ;;  %v105_v18 = vld [vmem:[#allocation2 + $0x290] sm:$0xff]  ;;  %v106_v19 = vld [vmem:[#allocation2 + $0x298] sm:$0xff]  ;;  %200 = vst [vmem:[#allocation5 + $0x288] sm:$0xff] %v104_v17 }
  0x3d   :  { %201 = vst [vmem:[#allocation5 + $0x290] sm:$0xff] %v105_v18  ;;  %202 = vst [vmem:[#allocation5 + $0x298] sm:$0xff] %v106_v19  ;;  %v107_v20 = vld [vmem:[#allocation2 + $0x2a0] sm:$0xff]  ;;  %v108_v21 = vld [vmem:[#allocation2 + $0x2a8] sm:$0xff] }
  0x3e   :  { %v109_v22 = vld [vmem:[#allocation2 + $0x2b0] sm:$0xff]  ;;  %203 = vst [vmem:[#allocation5 + $0x2a0] sm:$0xff] %v107_v20  ;;  %204 = vst [vmem:[#allocation5 + $0x2a8] sm:$0xff] %v108_v21  ;;  %v110_v23 = vld [vmem:[#allocation2 + $0x2b8] sm:$0xff] }
  0x3f   :  { %205 = vst [vmem:[#allocation5 + $0x2b0] sm:$0xff] %v109_v22  ;;  %v111_v24 = vld [vmem:[#allocation2 + $0x2c0] sm:$0xff]  ;;  %v112_v25 = vld [vmem:[#allocation2 + $0x2c8] sm:$0xff]  ;;  %206 = vst [vmem:[#allocation5 + $0x2b8] sm:$0xff] %v110_v23 }
  0x40   :  { %207 = vst [vmem:[#allocation5 + $0x2c0] sm:$0xff] %v111_v24  ;;  %208 = vst [vmem:[#allocation5 + $0x2c8] sm:$0xff] %v112_v25  ;;  %v113_v26 = vld [vmem:[#allocation2 + $0x2d0] sm:$0xff]  ;;  %v114_v27 = vld [vmem:[#allocation2 + $0x2d8] sm:$0xff] }
  0x41   :  { %v115_v28 = vld [vmem:[#allocation2 + $0x2e0] sm:$0xff]  ;;  %209 = vst [vmem:[#allocation5 + $0x2d0] sm:$0xff] %v113_v26  ;;  %210 = vst [vmem:[#allocation5 + $0x2d8] sm:$0xff] %v114_v27  ;;  %v116_v29 = vld [vmem:[#allocation2 + $0x2e8] sm:$0xff] }
  0x42   :  { %211 = vst [vmem:[#allocation5 + $0x2e0] sm:$0xff] %v115_v28  ;;  %v117_v30 = vld [vmem:[#allocation2 + $0x2f0] sm:$0xff]  ;;  %v118_v31 = vld [vmem:[#allocation2 + $0x2f8] sm:$0xff]  ;;  %212 = vst [vmem:[#allocation5 + $0x2e8] sm:$0xff] %v116_v29 }
  0x43   :  { %213 = vst [vmem:[#allocation5 + $0x2f0] sm:$0xff] %v117_v30  ;;  %214 = vst [vmem:[#allocation5 + $0x2f8] sm:$0xff] %v118_v31 }
  0x44   :  { %269 = shalt.err (!%p266_p12)
}
  0x45   :  { %s270_s24 = scalar_lea.hbm %s329_s1, 12288 }
  0x46   :  { %p271_p13 = scmp.ne.s32.totalorder %s329_s1, %s270_s24  ;;  %p274_p0 = scmp.lt.u32.totalorder %s270_s24, %s329_s1 }
  0x48   :  { %p276_p1 = pnand %p274_p0, %p271_p13 }
  0x4a   :  { %279 = shalt.err (!%p276_p1)
}
  0x4b   :  { %226 = dma.vmem_to_hbm [thread:$0]  %s221_s20, 12288, %s329_s1, [#allocation4], %s285_s16, %s285_s16, %s286_s17  }
  0x4c   :  { %282 = dma.done.wait [#allocation4], 12288  }
  0x4d   :  { %283 = vsyncadd [#allocation4], 4294955008 }
  0x4e   :  { %230 = vsyncpa [#allocation3], 1 }
  0x4f   :  { %231 = vsyncpa [#allocation4], 1 }

</bundles_post_ra>
